<compile_context>
chip_gen: v5e
topology: v5e:2x2
jax: 0.10.0
libtpu: 0.0.40
codegen_flags: <defaults>
</compile_context>

<pallas_src>
import jax
import jax.numpy as jnp
from jax.experimental import pallas as pl
from jax.experimental.pallas import tpu as pltpu


def ppo_value_kernel(x_ref, w1_ref, b1_ref, w2_ref, b2_ref, wv_ref, bv_ref,
                     out_ref):
    # x arrives f32 from HBM; cast to bf16 in-kernel (no separate XLA convert pass).
    x = x_ref[...].astype(jnp.bfloat16)                       # [TB, in_dim]

    # Linear1 + ReLU6 (bf16 MXU matmul, f32 accumulate; bias/clip in f32 on VPU)
    h1 = jnp.dot(x, w1_ref[...], preferred_element_type=jnp.float32)
    h1 = jnp.clip(h1 + b1_ref[...], 0.0, 6.0)                 # [TB, hid] f32

    # Linear2 + ReLU6
    h2 = jnp.dot(h1.astype(jnp.bfloat16), w2_ref[...],
                 preferred_element_type=jnp.float32)
    h2 = jnp.clip(h2 + b2_ref[...], 0.0, 6.0)                 # [TB, hid] f32

    # Value head (hid -> 1), emitted as a lane-dense [1, TB] row:
    # contract over hid of both operands (Q.K^T-style), output columns = batch.
    v = jnp.einsum('oh,bh->ob', wv_ref[...], h2,
                   preferred_element_type=jnp.float32)         # [1, TB] f32
    out_ref[...] = (v + bv_ref[...]).astype(out_ref.dtype)     # lane-dense store


def _round_up(n, m):
    return ((n + m - 1) // m) * m


def _choose_tile(B, batch_tile):
    """Batch tile: full (8-aligned) batch when tiny; otherwise ensure >= 2 tiles
    (megacore split on v7x) capped by batch_tile."""
    if B <= 32:
        return _round_up(B, 8)
    half = _round_up((B + 1) // 2, 16)
    return min(batch_tile, half)


def _vmem_limit_bytes(tb, in_dim, hid):
    """Rough per-step VMEM budget (double-buffered streams + resident weights),
    with headroom, capped at 32 MiB so it is safe on v7x (64 MiB physical)."""
    x_bytes = 2 * tb * in_dim * 4                      # double-buffered f32 x tile
    w_bytes = (in_dim * hid + hid * hid) * 2 \
        + (hid + hid + hid + 1) * 4                    # resident weights/biases
    act_bytes = 4 * tb * hid * 4                       # h1/h2/bf16 temps (f32-equiv)
    out_bytes = 2 * tb * 4                             # double-buffered [1, TB] row
    need = x_bytes + w_bytes + act_bytes + out_bytes
    return int(min(32 * 1024 * 1024, max(4 * 1024 * 1024, 4 * need)))


def ppo_value_forward(x, params, *, batch_tile=4096):
    """x: [B, in_dim] float32. params: dict of transposed weights / biases."""
    B, in_dim = x.shape
    hid = params["w1t"].shape[1]

    tb = _choose_tile(B, batch_tile)
    n_tiles = pl.cdiv(B, tb)           # no jnp.pad: trailing partial block is OK

    # Weights/biases prepped once (tiny); x is NOT cast here (done in-kernel).
    w1 = params["w1t"].astype(jnp.bfloat16)
    w2 = params["w2t"].astype(jnp.bfloat16)
    b1 = params["b1"].astype(jnp.float32)
    b2 = params["b2"].astype(jnp.float32)
    wv_row = params["wvt"].reshape(1, hid).astype(jnp.float32)
    bv = params["bv"].astype(jnp.float32)

    out = pl.pallas_call(
        ppo_value_kernel,
        out_shape=jax.ShapeDtypeStruct((n_tiles, tb), jnp.float32),
        grid=(n_tiles,),
        in_specs=[
            pl.BlockSpec((tb, in_dim), lambda i: (i, 0)),    # x: streamed per tile
            pl.BlockSpec((in_dim, hid), lambda i: (0, 0)),   # w1: VMEM-resident
            pl.BlockSpec((1, hid), lambda i: (0, 0)),        # b1: resident
            pl.BlockSpec((hid, hid), lambda i: (0, 0)),      # w2: resident
            pl.BlockSpec((1, hid), lambda i: (0, 0)),        # b2: resident
            pl.BlockSpec((1, hid), lambda i: (0, 0)),        # wv row: resident
            pl.BlockSpec((1, 1), lambda i: (0, 0)),          # bv: resident
        ],
        out_specs=pl.BlockSpec((1, tb), lambda i: (i, 0)),   # lane-dense row slab
        compiler_params=pltpu.CompilerParams(
            dimension_semantics=("parallel",),
            vmem_limit_bytes=_vmem_limit_bytes(tb, in_dim, hid),
        ),
    )(x, w1, b1, w2, b2, wv_row, bv)

    # (n_tiles, tb) -> (n_tiles*tb, 1) is contiguous (free); drop padded rows.
    return out.reshape(-1, 1)[:B]


def init_params(key, in_dim, hid_dim):
    """Deterministic synthetic init (PyTorch-style uniform fan-in bounds)."""
    ks = jax.random.split(key, 6)

    def uniform(k, shape, fan_in):
        bound = 1.0 / jnp.sqrt(fan_in)
        return jax.random.uniform(k, shape, jnp.float32, -bound, bound)

    # PyTorch stores W as [out, in]; we keep the transposed [in, out] layout.
    w1t = uniform(ks[0], (in_dim, hid_dim), in_dim)
    b1 = uniform(ks[1], (1, hid_dim), in_dim)
    w2t = uniform(ks[2], (hid_dim, hid_dim), hid_dim)
    b2 = uniform(ks[3], (1, hid_dim), hid_dim)
    wvt = uniform(ks[4], (hid_dim, 1), hid_dim)
    bv = uniform(ks[5], (1, 1), hid_dim)
    return dict(w1t=w1t, b1=b1, w2t=w2t, b2=b2, wvt=wvt, bv=bv)


def reference_forward(x, p):
    relu6 = lambda t: jnp.clip(t, 0.0, 6.0)
    h1 = relu6(x @ p["w1t"] + p["b1"])
    h2 = relu6(h1 @ p["w2t"] + p["b2"])
    return h2 @ p["wvt"] + p["bv"]


if __name__ == "__main__":
    IN_DIM, HID_DIM = 16, 32

    key = jax.random.PRNGKey(0)
    kx, kp = jax.random.split(key)
    params = init_params(kp, IN_DIM, HID_DIM)

    # Case 1: tiny batch -> single grid step, block covers the whole array.
    x_small = jax.random.normal(kx, (8, IN_DIM), jnp.float32)
    v_small = jax.block_until_ready(ppo_value_forward(x_small, params))
    ref_small = reference_forward(x_small, params)
    assert v_small.shape == (8, 1)
    assert jnp.allclose(v_small, ref_small, atol=2e-2, rtol=2e-2), \
        "small-batch mismatch vs reference"

    # Case 2: multi-tile batch with a trailing partial block -> exercises the
    # batch grid (>=2 tiles for megacore), resident weights, lane-dense output
    # slab, and the unpadded boundary handling.
    x_big = jax.random.normal(kx, (200, IN_DIM), jnp.float32)
    v_big = jax.block_until_ready(
        ppo_value_forward(x_big, params, batch_tile=128))
    ref_big = reference_forward(x_big, params)
    assert v_big.shape == (200, 1)
    assert jnp.allclose(v_big, ref_big, atol=2e-2, rtol=2e-2), \
        "tiled-batch mismatch vs reference"

    print("KERNEL_OK")
</pallas_src>

<mosaic_0001>
module attributes {stable_mosaic.version = 11 : i64} {
  func.func @ppo_value_kernel(%arg0: i32, %arg1: memref<8x16xf32, #tpu.memory_space<vmem>>, %arg2: memref<16x32xbf16, #tpu.memory_space<vmem>>, %arg3: memref<1x32xf32, #tpu.memory_space<vmem>>, %arg4: memref<32x32xbf16, #tpu.memory_space<vmem>>, %arg5: memref<1x32xf32, #tpu.memory_space<vmem>>, %arg6: memref<1x32xf32, #tpu.memory_space<vmem>>, %arg7: memref<1x1xf32, #tpu.memory_space<vmem>>, %arg8: memref<1x8xf32, #tpu.memory_space<vmem>>) attributes {dimension_semantics = [#tpu.dimension_semantics<parallel>], iteration_bounds = array<i64: 1>, scalar_prefetch = 0 : i64, scratch_operands = 0 : i64, tpu.core_type = #tpu.core_type<tc>, window_params = [{transform_indices = @transform_0, window_bounds = array<i64: 8, 16>}, {pipeline_mode = #tpu.pipeline_mode<synchronous>, transform_indices = @transform_1, window_bounds = array<i64: 16, 32>}, {pipeline_mode = #tpu.pipeline_mode<synchronous>, transform_indices = @transform_2, window_bounds = array<i64: 1, 32>}, {pipeline_mode = #tpu.pipeline_mode<synchronous>, transform_indices = @transform_3, window_bounds = array<i64: 32, 32>}, {pipeline_mode = #tpu.pipeline_mode<synchronous>, transform_indices = @transform_4, window_bounds = array<i64: 1, 32>}, {pipeline_mode = #tpu.pipeline_mode<synchronous>, transform_indices = @transform_5, window_bounds = array<i64: 1, 32>}, {pipeline_mode = #tpu.pipeline_mode<synchronous>, transform_indices = @transform_6, window_bounds = array<i64: 1, 1>}, {transform_indices = @transform_7, window_bounds = array<i64: 1, 8>}]} {
    %c0 = arith.constant 0 : index
    %c0_0 = arith.constant 0 : index
    %0 = vector.load %arg1[%c0, %c0_0] : memref<8x16xf32, #tpu.memory_space<vmem>>, vector<8x16xf32>
    %1 = arith.truncf %0 : vector<8x16xf32> to vector<8x16xbf16>
    %c0_1 = arith.constant 0 : index
    %c0_2 = arith.constant 0 : index
    %2 = vector.load %arg2[%c0_1, %c0_2] : memref<16x32xbf16, #tpu.memory_space<vmem>>, vector<16x32xbf16>
    %cst = arith.constant dense<0.000000e+00> : vector<8x32xf32>
    %3 = tpu.matmul %1, %2, %cst {dimension_numbers = #tpu.dot_dimension_numbers<[1], [0], [0], [1], [0, 0, 1, 1], [], []>} : vector<8x16xbf16>, vector<16x32xbf16>, vector<8x32xf32> -> vector<8x32xf32>
    %c0_3 = arith.constant 0 : index
    %c0_4 = arith.constant 0 : index
    %4 = vector.load %arg3[%c0_3, %c0_4] : memref<1x32xf32, #tpu.memory_space<vmem>>, vector<1x32xf32>
    %5 = vector.broadcast %4 : vector<1x32xf32> to vector<8x32xf32>
    %6 = arith.addf %3, %5 : vector<8x32xf32>
    %cst_5 = arith.constant 0.000000e+00 : f32
    %cst_6 = arith.constant 6.000000e+00 : f32
    %7 = vector.broadcast %cst_5 : f32 to vector<8x32xf32>
    %8 = arith.maximumf %7, %6 : vector<8x32xf32>
    %9 = vector.broadcast %cst_6 : f32 to vector<8x32xf32>
    %10 = arith.minimumf %9, %8 : vector<8x32xf32>
    %11 = arith.truncf %10 : vector<8x32xf32> to vector<8x32xbf16>
    %c0_7 = arith.constant 0 : index
    %c0_8 = arith.constant 0 : index
    %12 = vector.load %arg4[%c0_7, %c0_8] : memref<32x32xbf16, #tpu.memory_space<vmem>>, vector<32x32xbf16>
    %cst_9 = arith.constant dense<0.000000e+00> : vector<8x32xf32>
    %13 = tpu.matmul %11, %12, %cst_9 {dimension_numbers = #tpu.dot_dimension_numbers<[1], [0], [0], [1], [0, 0, 1, 1], [], []>} : vector<8x32xbf16>, vector<32x32xbf16>, vector<8x32xf32> -> vector<8x32xf32>
    %c0_10 = arith.constant 0 : index
    %c0_11 = arith.constant 0 : index
    %14 = vector.load %arg5[%c0_10, %c0_11] : memref<1x32xf32, #tpu.memory_space<vmem>>, vector<1x32xf32>
    %15 = vector.broadcast %14 : vector<1x32xf32> to vector<8x32xf32>
    %16 = arith.addf %13, %15 : vector<8x32xf32>
    %cst_12 = arith.constant 0.000000e+00 : f32
    %cst_13 = arith.constant 6.000000e+00 : f32
    %17 = vector.broadcast %cst_12 : f32 to vector<8x32xf32>
    %18 = arith.maximumf %17, %16 : vector<8x32xf32>
    %19 = vector.broadcast %cst_13 : f32 to vector<8x32xf32>
    %20 = arith.minimumf %19, %18 : vector<8x32xf32>
    %c0_14 = arith.constant 0 : index
    %c0_15 = arith.constant 0 : index
    %21 = vector.load %arg6[%c0_14, %c0_15] : memref<1x32xf32, #tpu.memory_space<vmem>>, vector<1x32xf32>
    "tpu.trace_start"() <{level = 10 : i32, message = "oh,bh->ob"}> : () -> ()
    %cst_16 = arith.constant dense<0.000000e+00> : vector<1x8xf32>
    %22 = tpu.matmul %21, %20, %cst_16 {dimension_numbers = #tpu.dot_dimension_numbers<[1], [1], [0], [0], [0, 0, 1, 0], [], []>} : vector<1x32xf32>, vector<8x32xf32>, vector<1x8xf32> -> vector<1x8xf32>
    "tpu.trace_stop"() : () -> ()
    %c0_17 = arith.constant 0 : index
    %c0_18 = arith.constant 0 : index
    %23 = vector.load %arg7[%c0_17, %c0_18] : memref<1x1xf32, #tpu.memory_space<vmem>>, vector<1x1xf32>
    %24 = vector.broadcast %23 : vector<1x1xf32> to vector<1x8xf32>
    %25 = arith.addf %22, %24 : vector<1x8xf32>
    %c0_19 = arith.constant 0 : index
    %c0_20 = arith.constant 0 : index
    %26 = vector.load %arg8[%c0_19, %c0_20] : memref<1x8xf32, #tpu.memory_space<vmem>>, vector<1x8xf32>
    tpu.vector_store %arg8[%c0_19, %c0_20], %25 {strides = array<i32>} : memref<1x8xf32, #tpu.memory_space<vmem>>, vector<1x8xf32>,
    return
  }
  func.func @transform_0(%arg0: i32) -> (i32, i32) {
    %c0_i32 = arith.constant 0 : i32
    %c0_i32_0 = arith.constant 0 : i32
    return %arg0, %c0_i32 : i32, i32
  }
  func.func @transform_1(%arg0: i32) -> (i32, i32) {
    %c0_i32 = arith.constant 0 : i32
    %c0_i32_0 = arith.constant 0 : i32
    %c0_i32_1 = arith.constant 0 : i32
    return %c0_i32, %c0_i32_0 : i32, i32
  }
  func.func @transform_2(%arg0: i32) -> (i32, i32) {
    %c0_i32 = arith.constant 0 : i32
    %c0_i32_0 = arith.constant 0 : i32
    %c0_i32_1 = arith.constant 0 : i32
    return %c0_i32, %c0_i32_0 : i32, i32
  }
  func.func @transform_3(%arg0: i32) -> (i32, i32) {
    %c0_i32 = arith.constant 0 : i32
    %c0_i32_0 = arith.constant 0 : i32
    %c0_i32_1 = arith.constant 0 : i32
    return %c0_i32, %c0_i32_0 : i32, i32
  }
  func.func @transform_4(%arg0: i32) -> (i32, i32) {
    %c0_i32 = arith.constant 0 : i32
    %c0_i32_0 = arith.constant 0 : i32
    %c0_i32_1 = arith.constant 0 : i32
    return %c0_i32, %c0_i32_0 : i32, i32
  }
  func.func @transform_5(%arg0: i32) -> (i32, i32) {
    %c0_i32 = arith.constant 0 : i32
    %c0_i32_0 = arith.constant 0 : i32
    %c0_i32_1 = arith.constant 0 : i32
    return %c0_i32, %c0_i32_0 : i32, i32
  }
  func.func @transform_6(%arg0: i32) -> (i32, i32) {
    %c0_i32 = arith.constant 0 : i32
    %c0_i32_0 = arith.constant 0 : i32
    %c0_i32_1 = arith.constant 0 : i32
    return %c0_i32, %c0_i32_0 : i32, i32
  }
  func.func @transform_7(%arg0: i32) -> (i32, i32) {
    %c0_i32 = arith.constant 0 : i32
    %c0_i32_0 = arith.constant 0 : i32
    return %arg0, %c0_i32 : i32, i32
  }
}

</mosaic_0001>

<bundles_post_ra>
// kernel: tpu_custom_call.1
= control target key start
LH: loop header
LB: loop body
LE: loop exit
PB: predicated region body
PF: predicated region fallthrough
CT: control target
= control target key end

     0   :  { %s407_s0 = inlined_call_operand.hbm [shape: f32[8,16], index: 0, kind: input, shape index: {}]   ;;  %s408_s1 = inlined_call_operand.hbm [shape: bf16[16,32], index: 1, kind: input, shape index: {}]   ;;  %s409_s2 = inlined_call_operand.vmem [shape: f32[1,32], index: 2, kind: input, shape index: {}]   ;;  %s410_s3 = inlined_call_operand.hbm [shape: bf16[32,32], index: 3, kind: input, shape index: {}]   ;;  %s411_s4 = inlined_call_operand.vmem [shape: f32[1,32], index: 4, kind: input, shape index: {}]   ;;  %s412_s5 = inlined_call_operand.vmem [shape: f32[1,32], index: 5, kind: input, shape index: {}]   ;;  %s413_s6 = inlined_call_operand.<no memory space> [shape: f32[1,1], index: 6, kind: input, shape index: {}]   ;;  %s414_s7 = inlined_call_operand.hbm [shape: f32[1,8], index: 7, kind: output, shape index: {}]  }
   0x1   :  { %v12_v0 = vstv %s413_s6 }
   0x2   :  { %13 = vst [vmem:[#allocation2] sm:$0x1] %v12_v0 }
   0x3   :  { %14 = vsyncpa [#allocation4], 0 }
   0x4   :  { %15 = vsyncpa [#allocation7], 0  ;;  %s32_s28 = sshll.u32 %s408_s1, 4  ;;  %s33_s28 = int_to_ptr.hbm [resolvable:$true] %s32_s28 }
   0x5   :  { %16 = vsyncpa [#allocation5], 0  ;;  %s333_s29 = smov [#allocation6]   ;;  %s22_s10 = sshll.u32 %s407_s0, 4  ;;  %s23_s10 = int_to_ptr.hbm [resolvable:$true] %s22_s10 }
   0x6   :  { %s34_s30 = sshll.u32 %s333_s29, 4  ;;  %s334_s11 = smov 64   ;;  %s35_s30 = int_to_ptr.vmem [resolvable:$true] %s34_s30 }
   0x7   :  { %s335_s12 = smov 4   ;;  %s336_s6 = smov [#allocation3]  }
   0x8   :  { %40 = dma.hbm_to_vmem [thread:$0]  %s33_s28, 128, %s35_s30, [#allocation7], %s334_s11, %s334_s11, %s335_s12  }
   0x9   :  { %s24_s13 = sshll.u32 %s336_s6, 4  ;;  %s47_s16 = sshll.u32 %s410_s3, 4  ;;  %s25_s13 = int_to_ptr.vmem [resolvable:$true] %s24_s13  ;;  %s48_s16 = int_to_ptr.hbm [resolvable:$true] %s47_s16 }
   0xa   :  { %27 = dma.hbm_to_vmem [thread:$0]  %s23_s10, 128, %s25_s13, [#allocation4]  }
   0xb   :  { %s337_s1 = smov [#allocation8]  }
   0xc   :  { %s49_s17 = sshll.u32 %s337_s1, 4  ;;  %s50_s17 = int_to_ptr.vmem [resolvable:$true] %s49_s17 }
   0xd   :  { %55 = dma.hbm_to_vmem [thread:$0]  %s48_s16, 256, %s50_s17, [#allocation7], %s334_s11, %s334_s11, %s335_s12  }
   0xe   :  { %327 = dma.done.wait [#allocation4], 128  }
   0xf   :  { %328 = vsyncadd [#allocation4], 4294967168 }
  0x10   :  { %329 = dma.done.wait [#allocation7], 384  }
  0x11   :  { %330 = vsyncadd [#allocation7], 4294966912  ;;  %v218_v1 = vld [vmem:[#allocation6] sm:$0xff]  ;;  %v75_v2 = vld [vmem:[#allocation3] sm:$0xff]  ;;  %vm89_vm0 = vcmask 130048   ;;  %vm129_vm1 = vcmask 261120  }
  0x12   :  { %v76_v3 = vpack.c.bf16 %v75_v2, %v75_v2  ;;  %100 = vmatpush.bf16.msra.mxu0 %v218_v1  ;;  %v220_v4 = vld [vmem:[#allocation8 + $0x8] sm:$0xff]  ;;  %v219_v5 = vld [vmem:[#allocation8] sm:$0xff]  ;;  %v338_v14 = vmov 0   ;;  %s339_s21 = smov [#allocation9]   ;;  %vm182_vm2 = vcmask 57344  }
  0x13   :  { %139 = vmatpush.bf16.msra.mxu1 %v220_v4  ;;  %v229_v6 = vld [vmem:[%s409_s2] ss:$0 sm:$0xff]  ;;  %228 = vset.pattern.permute.xlu0 %v338_v14  ;;  %s189_s22 = sshll.u32 %s339_s21, 4  ;;  %s190_s22 = int_to_ptr.vmem [resolvable:$true] %s189_s22 }
  0x14   :  { %v149_v13 = vld [vmem:[#allocation2] sm:$0x1] }
  0x15   :  { %206 = vmatmul.msk.bf16.vlgmr.msra.gmra.mxu0 %vm89_vm0, %v76_v3  ;;  %152 = vperm.xlu0 %228, %v149_v13   ;;  %v230_v15 = vld [vmem:[%s411_s4] ss:$0 sm:$0xff]  ;;  %s191_s4 = sshll.u32 %s414_s7, 4  ;;  %s192_s4 = int_to_ptr.hbm [resolvable:$true] %s191_s4 }
  0x16   :  { %v148_v20 = vld [vmem:[%s412_s5] sm:$0x1] }
  0x17   :  { %140 = vmatpush.bf16.msra.mxu1 %v219_v5 }
  0x87   :  { %v153_v22 = vpop.permute.xlu0 %152 }
  0x88   :  { %v155_v23 = vperm.slane %v153_v22, 0 }
  0x92   :  { %v102_v7 = vpop.f32.mrf.mxu0 }
  0x93   :  { %v103_v8 = vadd.f32 %v229_v6, %v102_v7 }
  0x95   :  { %v106_v9 = vmax.f32 %v103_v8, 0.0 }
  0x97   :  { %v107_v10 = vmin.f32 %v106_v9, 6.0 }
  0x99   :  { %v108_v11 = vpack.c.bf16 %v107_v10, %v107_v10 }
  0x9a   :  { %v104_v12 = vpop.f32.mrf.mxu0 }
  0x9b   :  { %215 = vmatmul.msk.bf16.vlgmr.msra.gmra.mxu1 %vm129_vm1, %v108_v11 }
 0x118   :  { %v142_v16 = vpop.f32.mrf.mxu1 }
 0x119   :  { %v143_v17 = vadd.f32 %v230_v15, %v142_v16 }
 0x11b   :  { %v146_v18 = vmax.f32 %v143_v17, 0.0 }
 0x11d   :  { %v147_v19 = vmin.f32 %v146_v18, 6.0 }
 0x11f   :  { %216 = vmatpush.xpose.msk.msra.mxu2 %vm129_vm1, %v147_v19 }
 0x120   :  { %v144_v21 = vpop.f32.mrf.mxu1 }
 0x122   :  { %217 = vmatmul.msk.f32.vlgmr.msra.gmra.mxu2 %vm129_vm1, %v148_v20 }
 0x1a5   :  { %v179_v24 = vpop.f32.mrf.mxu2 }
 0x1a6   :  { %v180_v25 = vadd.f32 %v179_v24, %v155_v23 }
 0x1a8   :  { %183 = vst.msk [vmem:[#allocation9] sm:$0x1] %vm182_vm2, %v180_v25 }
 0x1a9   :  { %194 = dma.vmem_to_hbm [thread:$0]  %s190_s22, 16, %s192_s4, [#allocation5]  }
 0x1aa   :  { %331 = dma.done.wait [#allocation5], 16  }
 0x1ab   :  { %332 = vsyncadd [#allocation5], 4294967280 }
 0x1ac   :  { %199 = vsyncpa [#allocation4], 1 }
 0x1ad   :  { %200 = vsyncpa [#allocation7], 1 }
 0x1ae   :  { %201 = vsyncpa [#allocation5], 1 }

</bundles_post_ra>
